<compile_context>
chip_gen: v5e
topology: v5e:2x2
jax: 0.10.0
libtpu: 0.0.40
codegen_flags: <defaults>
</compile_context>

<pallas_src>
import jax
import jax.numpy as jnp
from jax import lax
from jax.experimental import pallas as pl
from jax.experimental.pallas import tpu as pltpu

LANE = 128


def _round_up(x, m):
    return ((x + m - 1) // m) * m


def mlp_kernel(x_ref, w1_ref, b1_ref, w2_ref, b2_ref, w3_ref, b3_ref,
               w7t_ref, b7_ref, o_ref):
    # One batch tile through the whole padded MLP.  Weights are bf16 and stay
    # VMEM-resident across grid steps (constant index_map); dots accumulate in
    # f32 on the MXU; bias-add + ReLU run in f32 on the VPU.
    x = x_ref[...]                                                    # (tb, F_r) bf16
    h = jnp.dot(x, w1_ref[...], preferred_element_type=jnp.float32) + b1_ref[...]
    h = jnp.maximum(h, 0.0).astype(jnp.bfloat16)                      # (tb, 128)
    h = jnp.dot(h, w2_ref[...], preferred_element_type=jnp.float32) + b2_ref[...]
    h = jnp.maximum(h, 0.0).astype(jnp.bfloat16)                      # (tb, 256)
    h = jnp.dot(h, w3_ref[...], preferred_element_type=jnp.float32) + b3_ref[...]
    h = jnp.maximum(h, 0.0).astype(jnp.bfloat16)                      # (tb, 128)
    # Final layer, batch-on-lanes: contract the fc7 column (padded to 8 rows,
    # only row 0 nonzero) against h's hidden axis -> (8, tb); keep row 0.
    out8 = lax.dot_general(
        w7t_ref[...], h,
        dimension_numbers=(((1,), (1,)), ((), ())),
        preferred_element_type=jnp.float32)                           # (8, tb)
    o_ref[...] = out8[0:1, :] + b7_ref[...]                           # (1, tb) f32


def init_params(key, n_features):
    """Deterministic init mimicking PyTorch nn.Linear default (U[-1/sqrt(fan_in), +])."""
    dims = [(n_features, 100), (100, 200), (200, 100), (100, 1)]
    names = ["1", "2", "3", "7"]
    params = {}
    for (fan_in, fan_out), name in zip(dims, names):
        key, kw, kb = jax.random.split(key, 3)
        bound = 1.0 / jnp.sqrt(fan_in)
        params[f"w{name}"] = jax.random.uniform(
            kw, (fan_in, fan_out), jnp.float32, -bound, bound)
        params[f"b{name}"] = jax.random.uniform(
            kb, (1, fan_out), jnp.float32, -bound, bound)
    return params


def prepare_params(params, n_features):
    """Pad layers for the kernel and cast weights to bf16.

    Hidden dims are zero-padded to lane multiples (100->128, 200->256,
    100->128); the feature (contraction) axis is only padded to 16 (bf16
    sublane packing).  Zero-padded bias lanes + zero weight rows make the
    padding exact through ReLU.  fc7 keeps only its single useful column,
    transposed into row 0 of an (8, 128) bf16 block (rows 1..7 zero).
    """
    f_r = _round_up(max(n_features, 1), 16)

    def pad(w, b, fi_p, fo_p):
        fi, fo = w.shape
        wp = jnp.zeros((fi_p, fo_p), jnp.float32).at[:fi, :fo].set(w)
        bp = jnp.zeros((1, fo_p), jnp.float32).at[:, :fo].set(b)
        return wp.astype(jnp.bfloat16), bp  # bf16 weights, f32 biases

    out = {}
    out["w1"], out["b1"] = pad(params["w1"], params["b1"], f_r, 128)
    out["w2"], out["b2"] = pad(params["w2"], params["b2"], 128, 256)
    out["w3"], out["b3"] = pad(params["w3"], params["b3"], 256, 128)
    h3 = params["w7"].shape[0]  # 100
    w7t = jnp.zeros((8, LANE), jnp.float32).at[0, :h3].set(params["w7"][:, 0])
    out["w7t"] = w7t.astype(jnp.bfloat16)
    out["b7"] = params["b7"].reshape(1, 1).astype(jnp.float32)
    return out


def _choose_tile(B, tile_b):
    """Pick a batch tile: big (overhead-amortizing), lane-friendly, low waste."""
    B16 = _round_up(B, 16)
    if B16 <= tile_b:
        return B16  # single tile covering the whole (16-padded) batch
    # Multiple grid steps: keep tb a multiple of 128 so the (1, tb) output
    # block is lane-dense even when it is not the full array extent.
    tb = max(LANE, (min(tile_b, B16) // LANE) * LANE)
    # Clamp tb so batch-padding waste stays small relative to B.
    while tb > LANE and (_round_up(B, tb) - B) > max(LANE, B // 8):
        tb -= LANE
    return tb


def net_forward(x, padded_params, *, tile_b=1024, split_for_megacore=False):
    """x: (B, n_features) float32.  padded_params: output of prepare_params.

    split_for_megacore: enable only on 2-TensorCore chips (v7x); it halves a
    single-step grid so the "parallel" axis can shard across both cores.
    """
    B, F = x.shape
    F_r = padded_params["w1"].shape[0]
    assert F <= F_r

    tb = _choose_tile(B, tile_b)
    B_pad = _round_up(B, tb)
    if split_for_megacore and B_pad == tb and tb % 256 == 0:
        tb //= 2  # grid becomes 2; halves stay multiples of 128

    # Pad batch rows with zeros and the feature axis only to F_r (<=16 extra
    # columns); cast once to bf16 so the per-step input DMA is half-size.
    x_pad = jnp.zeros((B_pad, F_r), jnp.bfloat16).at[:B, :F].set(
        x.astype(jnp.bfloat16))

    w1, b1 = padded_params["w1"], padded_params["b1"]
    w2, b2 = padded_params["w2"], padded_params["b2"]
    w3, b3 = padded_params["w3"], padded_params["b3"]
    w7t, b7 = padded_params["w7t"], padded_params["b7"]

    def full_spec(arr):
        # Whole-array block, same for every grid step -> stays VMEM-resident.
        return pl.BlockSpec(arr.shape, lambda i: (0, 0))

    grid = (B_pad // tb,)
    out = pl.pallas_call(
        mlp_kernel,
        out_shape=jax.ShapeDtypeStruct((1, B_pad), jnp.float32),
        grid_spec=pltpu.PrefetchScalarGridSpec(
            num_scalar_prefetch=0,
            grid=grid,
            in_specs=[
                pl.BlockSpec((tb, F_r), lambda i: (i, 0)),   # x batch tile
                full_spec(w1), full_spec(b1),
                full_spec(w2), full_spec(b2),
                full_spec(w3), full_spec(b3),
                full_spec(w7t), full_spec(b7),
            ],
            out_specs=pl.BlockSpec((1, tb), lambda i: (0, i)),
        ),
        compiler_params=pltpu.CompilerParams(
            dimension_semantics=("parallel",)),
    )(x_pad, w1, b1, w2, b2, w3, b3, w7t, b7)
    # (1, B_pad) row -> (B, 1) column; only batch padding gets sliced off.
    return out[0, :B].reshape(B, 1)


def reference_forward_bf16(x, pp):
    """Pure-JAX reference using the identical bf16-weight / f32-accumulate recipe."""
    B, F = x.shape
    F_r = pp["w1"].shape[0]
    xb = jnp.zeros((B, F_r), jnp.bfloat16).at[:, :F].set(x.astype(jnp.bfloat16))
    h = jnp.maximum(
        jnp.dot(xb, pp["w1"], preferred_element_type=jnp.float32) + pp["b1"], 0.0)
    h = jnp.maximum(
        jnp.dot(h.astype(jnp.bfloat16), pp["w2"],
                preferred_element_type=jnp.float32) + pp["b2"], 0.0)
    h = jnp.maximum(
        jnp.dot(h.astype(jnp.bfloat16), pp["w3"],
                preferred_element_type=jnp.float32) + pp["b3"], 0.0)
    out8 = lax.dot_general(pp["w7t"], h.astype(jnp.bfloat16),
                           dimension_numbers=(((1,), (1,)), ((), ())),
                           preferred_element_type=jnp.float32)
    return (out8[0:1, :] + pp["b7"]).T                                # (B, 1)


def reference_forward_f32(x, params):
    """Pure-f32 reference matching the original PyTorch semantics."""
    h = jnp.maximum(x @ params["w1"] + params["b1"], 0.0)
    h = jnp.maximum(h @ params["w2"] + params["b2"], 0.0)
    h = jnp.maximum(h @ params["w3"] + params["b3"], 0.0)
    return h @ params["w7"] + params["b7"]


if __name__ == "__main__":
    key = jax.random.PRNGKey(0)
    kx, kx2, kp = jax.random.split(key, 3)
    n_features = 32

    params = init_params(kp, n_features)
    pp = prepare_params(params, n_features)

    # Small batch: single-tile path.
    x = jax.random.normal(kx, (8, n_features), jnp.float32)
    out = jax.block_until_ready(net_forward(x, pp))
    assert out.shape == (8, 1)
    ref_bf16 = reference_forward_bf16(x, pp)
    assert jnp.allclose(out, ref_bf16, atol=1e-4, rtol=1e-4), "mismatch vs bf16 reference"
    ref_f32 = reference_forward_f32(x, params)
    assert jnp.allclose(out, ref_f32, atol=1e-1, rtol=1e-1), "mismatch vs f32 reference"

    # Larger awkward batch: exercises multi-tile grid + padding-waste clamp.
    x2 = jax.random.normal(kx2, (2100, n_features), jnp.float32)
    out2 = jax.block_until_ready(net_forward(x2, pp, tile_b=1024))
    assert out2.shape == (2100, 1)
    ref2 = reference_forward_bf16(x2, pp)
    assert jnp.allclose(out2, ref2, atol=1e-4, rtol=1e-4), "mismatch vs bf16 reference (tiled)"

    print("KERNEL_OK")
</pallas_src>

<mosaic_0001>
module attributes {stable_mosaic.version = 11 : i64} {
  func.func @mlp_kernel(%arg0: i32, %arg1: memref<16x32xbf16, #tpu.memory_space<vmem>>, %arg2: memref<32x128xbf16, #tpu.memory_space<vmem>>, %arg3: memref<1x128xf32, #tpu.memory_space<vmem>>, %arg4: memref<128x256xbf16, #tpu.memory_space<vmem>>, %arg5: memref<1x256xf32, #tpu.memory_space<vmem>>, %arg6: memref<256x128xbf16, #tpu.memory_space<vmem>>, %arg7: memref<1x128xf32, #tpu.memory_space<vmem>>, %arg8: memref<8x128xbf16, #tpu.memory_space<vmem>>, %arg9: memref<1x1xf32, #tpu.memory_space<vmem>>, %arg10: memref<1x16xf32, #tpu.memory_space<vmem>>) attributes {dimension_semantics = [#tpu.dimension_semantics<parallel>], iteration_bounds = array<i64: 1>, scalar_prefetch = 0 : i64, scratch_operands = 0 : i64, tpu.core_type = #tpu.core_type<tc>, window_params = [{transform_indices = @transform_0, window_bounds = array<i64: 16, 32>}, {pipeline_mode = #tpu.pipeline_mode<synchronous>, transform_indices = @transform_1, window_bounds = array<i64: 32, 128>}, {pipeline_mode = #tpu.pipeline_mode<synchronous>, transform_indices = @transform_2, window_bounds = array<i64: 1, 128>}, {pipeline_mode = #tpu.pipeline_mode<synchronous>, transform_indices = @transform_3, window_bounds = array<i64: 128, 256>}, {pipeline_mode = #tpu.pipeline_mode<synchronous>, transform_indices = @transform_4, window_bounds = array<i64: 1, 256>}, {pipeline_mode = #tpu.pipeline_mode<synchronous>, transform_indices = @transform_5, window_bounds = array<i64: 256, 128>}, {pipeline_mode = #tpu.pipeline_mode<synchronous>, transform_indices = @transform_6, window_bounds = array<i64: 1, 128>}, {pipeline_mode = #tpu.pipeline_mode<synchronous>, transform_indices = @transform_7, window_bounds = array<i64: 8, 128>}, {pipeline_mode = #tpu.pipeline_mode<synchronous>, transform_indices = @transform_8, window_bounds = array<i64: 1, 1>}, {transform_indices = @transform_9, window_bounds = array<i64: 1, 16>}]} {
    %c0 = arith.constant 0 : index
    %c0_0 = arith.constant 0 : index
    %0 = vector.load %arg1[%c0, %c0_0] : memref<16x32xbf16, #tpu.memory_space<vmem>>, vector<16x32xbf16>
    %c0_1 = arith.constant 0 : index
    %c0_2 = arith.constant 0 : index
    %1 = vector.load %arg2[%c0_1, %c0_2] : memref<32x128xbf16, #tpu.memory_space<vmem>>, vector<32x128xbf16>
    %cst = arith.constant dense<0.000000e+00> : vector<16x128xf32>
    %2 = tpu.matmul %0, %1, %cst {dimension_numbers = #tpu.dot_dimension_numbers<[1], [0], [0], [1], [0, 0, 1, 1], [], []>} : vector<16x32xbf16>, vector<32x128xbf16>, vector<16x128xf32> -> vector<16x128xf32>
    %c0_3 = arith.constant 0 : index
    %c0_4 = arith.constant 0 : index
    %3 = vector.load %arg3[%c0_3, %c0_4] : memref<1x128xf32, #tpu.memory_space<vmem>>, vector<1x128xf32>
    %4 = vector.broadcast %3 : vector<1x128xf32> to vector<16x128xf32>
    %5 = arith.addf %2, %4 : vector<16x128xf32>
    %cst_5 = arith.constant 0.000000e+00 : f32
    %6 = vector.broadcast %cst_5 : f32 to vector<16x128xf32>
    %7 = arith.maximumf %5, %6 : vector<16x128xf32>
    %8 = arith.truncf %7 : vector<16x128xf32> to vector<16x128xbf16>
    %c0_6 = arith.constant 0 : index
    %c0_7 = arith.constant 0 : index
    %9 = vector.load %arg4[%c0_6, %c0_7] : memref<128x256xbf16, #tpu.memory_space<vmem>>, vector<128x256xbf16>
    %cst_8 = arith.constant dense<0.000000e+00> : vector<16x256xf32>
    %10 = tpu.matmul %8, %9, %cst_8 {dimension_numbers = #tpu.dot_dimension_numbers<[1], [0], [0], [1], [0, 0, 1, 1], [], []>} : vector<16x128xbf16>, vector<128x256xbf16>, vector<16x256xf32> -> vector<16x256xf32>
    %c0_9 = arith.constant 0 : index
    %c0_10 = arith.constant 0 : index
    %11 = vector.load %arg5[%c0_9, %c0_10] : memref<1x256xf32, #tpu.memory_space<vmem>>, vector<1x256xf32>
    %12 = vector.broadcast %11 : vector<1x256xf32> to vector<16x256xf32>
    %13 = arith.addf %10, %12 : vector<16x256xf32>
    %cst_11 = arith.constant 0.000000e+00 : f32
    %14 = vector.broadcast %cst_11 : f32 to vector<16x256xf32>
    %15 = arith.maximumf %13, %14 : vector<16x256xf32>
    %16 = arith.truncf %15 : vector<16x256xf32> to vector<16x256xbf16>
    %c0_12 = arith.constant 0 : index
    %c0_13 = arith.constant 0 : index
    %17 = vector.load %arg6[%c0_12, %c0_13] : memref<256x128xbf16, #tpu.memory_space<vmem>>, vector<256x128xbf16>
    %cst_14 = arith.constant dense<0.000000e+00> : vector<16x128xf32>
    %18 = tpu.matmul %16, %17, %cst_14 {dimension_numbers = #tpu.dot_dimension_numbers<[1], [0], [0], [1], [0, 0, 1, 1], [], []>} : vector<16x256xbf16>, vector<256x128xbf16>, vector<16x128xf32> -> vector<16x128xf32>
    %c0_15 = arith.constant 0 : index
    %c0_16 = arith.constant 0 : index
    %19 = vector.load %arg7[%c0_15, %c0_16] : memref<1x128xf32, #tpu.memory_space<vmem>>, vector<1x128xf32>
    %20 = vector.broadcast %19 : vector<1x128xf32> to vector<16x128xf32>
    %21 = arith.addf %18, %20 : vector<16x128xf32>
    %cst_17 = arith.constant 0.000000e+00 : f32
    %22 = vector.broadcast %cst_17 : f32 to vector<16x128xf32>
    %23 = arith.maximumf %21, %22 : vector<16x128xf32>
    %24 = arith.truncf %23 : vector<16x128xf32> to vector<16x128xbf16>
    %c0_18 = arith.constant 0 : index
    %c0_19 = arith.constant 0 : index
    %25 = vector.load %arg8[%c0_18, %c0_19] : memref<8x128xbf16, #tpu.memory_space<vmem>>, vector<8x128xbf16>
    %cst_20 = arith.constant dense<0.000000e+00> : vector<8x16xf32>
    %26 = tpu.matmul %25, %24, %cst_20 {dimension_numbers = #tpu.dot_dimension_numbers<[1], [1], [0], [0], [0, 0, 1, 0], [], []>} : vector<8x128xbf16>, vector<16x128xbf16>, vector<8x16xf32> -> vector<8x16xf32>
    %27 = vector.extract_strided_slice %26 {offsets = [0, 0], sizes = [1, 16], strides = [1, 1]} : vector<8x16xf32> to vector<1x16xf32>
    %c0_21 = arith.constant 0 : index
    %c0_22 = arith.constant 0 : index
    %28 = vector.load %arg9[%c0_21, %c0_22] : memref<1x1xf32, #tpu.memory_space<vmem>>, vector<1x1xf32>
    %29 = vector.broadcast %28 : vector<1x1xf32> to vector<1x16xf32>
    %30 = arith.addf %27, %29 : vector<1x16xf32>
    %c0_23 = arith.constant 0 : index
    %c0_24 = arith.constant 0 : index
    %31 = vector.load %arg10[%c0_23, %c0_24] : memref<1x16xf32, #tpu.memory_space<vmem>>, vector<1x16xf32>
    tpu.vector_store %arg10[%c0_23, %c0_24], %30 {strides = array<i32>} : memref<1x16xf32, #tpu.memory_space<vmem>>, vector<1x16xf32>,
    return
  }
  func.func @transform_0(%arg0: i32) -> (i32, i32) {
    %c0_i32 = arith.constant 0 : i32
    %c0_i32_0 = arith.constant 0 : i32
    return %arg0, %c0_i32 : i32, i32
  }
  func.func @transform_1(%arg0: i32) -> (i32, i32) {
    %c0_i32 = arith.constant 0 : i32
    %c0_i32_0 = arith.constant 0 : i32
    %c0_i32_1 = arith.constant 0 : i32
    return %c0_i32, %c0_i32_0 : i32, i32
  }
  func.func @transform_2(%arg0: i32) -> (i32, i32) {
    %c0_i32 = arith.constant 0 : i32
    %c0_i32_0 = arith.constant 0 : i32
    %c0_i32_1 = arith.constant 0 : i32
    return %c0_i32, %c0_i32_0 : i32, i32
  }
  func.func @transform_3(%arg0: i32) -> (i32, i32) {
    %c0_i32 = arith.constant 0 : i32
    %c0_i32_0 = arith.constant 0 : i32
    %c0_i32_1 = arith.constant 0 : i32
    return %c0_i32, %c0_i32_0 : i32, i32
  }
  func.func @transform_4(%arg0: i32) -> (i32, i32) {
    %c0_i32 = arith.constant 0 : i32
    %c0_i32_0 = arith.constant 0 : i32
    %c0_i32_1 = arith.constant 0 : i32
    return %c0_i32, %c0_i32_0 : i32, i32
  }
  func.func @transform_5(%arg0: i32) -> (i32, i32) {
    %c0_i32 = arith.constant 0 : i32
    %c0_i32_0 = arith.constant 0 : i32
    %c0_i32_1 = arith.constant 0 : i32
    return %c0_i32, %c0_i32_0 : i32, i32
  }
  func.func @transform_6(%arg0: i32) -> (i32, i32) {
    %c0_i32 = arith.constant 0 : i32
    %c0_i32_0 = arith.constant 0 : i32
    %c0_i32_1 = arith.constant 0 : i32
    return %c0_i32, %c0_i32_0 : i32, i32
  }
  func.func @transform_7(%arg0: i32) -> (i32, i32) {
    %c0_i32 = arith.constant 0 : i32
    %c0_i32_0 = arith.constant 0 : i32
    %c0_i32_1 = arith.constant 0 : i32
    return %c0_i32, %c0_i32_0 : i32, i32
  }
  func.func @transform_8(%arg0: i32) -> (i32, i32) {
    %c0_i32 = arith.constant 0 : i32
    %c0_i32_0 = arith.constant 0 : i32
    %c0_i32_1 = arith.constant 0 : i32
    return %c0_i32, %c0_i32_0 : i32, i32
  }
  func.func @transform_9(%arg0: i32) -> (i32, i32) {
    %c0_i32 = arith.constant 0 : i32
    %c0_i32_0 = arith.constant 0 : i32
    return %c0_i32, %arg0 : i32, i32
  }
}

</mosaic_0001>

<bundles_post_ra>
// kernel: tpu_custom_call.1
= control target key start
LH: loop header
LB: loop body
LE: loop exit
PB: predicated region body
PF: predicated region fallthrough
CT: control target
= control target key end

     0   :  { %s935_s0 = inlined_call_operand.hbm [shape: bf16[16,32], index: 0, kind: input, shape index: {}]   ;;  %s936_s1 = inlined_call_operand.hbm [shape: bf16[32,128], index: 1, kind: input, shape index: {}]   ;;  %s937_s2 = inlined_call_operand.vmem [shape: f32[1,128], index: 2, kind: input, shape index: {}]   ;;  %s938_s3 = inlined_call_operand.hbm [shape: bf16[128,256], index: 3, kind: input, shape index: {}]   ;;  %s939_s4 = inlined_call_operand.vmem [shape: f32[1,256], index: 4, kind: input, shape index: {}]   ;;  %s940_s5 = inlined_call_operand.hbm [shape: bf16[256,128], index: 5, kind: input, shape index: {}]   ;;  %s941_s6 = inlined_call_operand.hbm [shape: f32[1,128], index: 6, kind: input, shape index: {}]   ;;  %s942_s7 = inlined_call_operand.vmem [shape: bf16[8,128], index: 7, kind: input, shape index: {}]   ;;  %s943_s8 = inlined_call_operand.<no memory space> [shape: f32[1,1], index: 8, kind: input, shape index: {}]   ;;  %s944_s9 = inlined_call_operand.hbm [shape: f32[1,16], index: 9, kind: output, shape index: {}]  }
   0x1   :  { %v14_v0 = vstv %s943_s8 }
   0x2   :  { %15 = vst [vmem:[#allocation2] sm:$0x1] %v14_v0 }
   0x3   :  { %16 = vsyncpa [#allocation4], 0 }
   0x4   :  { %17 = vsyncpa [#allocation7], 0 }
   0x5   :  { %18 = vsyncpa [#allocation10], 0 }
   0x6   :  { %19 = vsyncpa [#allocation5], 0  ;;  %s37_s13 = sshll.u32 %s936_s1, 4  ;;  %s844_s14 = smov [#allocation6]   ;;  %s38_s13 = int_to_ptr.hbm [resolvable:$true] %s37_s13 }
   0x7   :  { %s39_s15 = sshll.u32 %s844_s14, 4  ;;  %s67_s18 = sshll.u32 %s940_s5, 4  ;;  %s40_s15 = int_to_ptr.vmem [resolvable:$true] %s39_s15  ;;  %s68_s18 = int_to_ptr.hbm [resolvable:$true] %s67_s18 }
   0x8   :  { %s845_s19 = smov 64   ;;  %s846_s20 = smov 4  }
   0x9   :  { %45 = dma.hbm_to_vmem [thread:$0]  %s38_s13, 256, %s40_s15, [#allocation7], %s845_s19, %s845_s19, %s846_s20  }
   0xa   :  { %s847_s8 = smov [#allocation9]   ;;  %s24_s24 = sshll.u32 %s935_s0, 4  ;;  %s25_s24 = int_to_ptr.hbm [resolvable:$true] %s24_s24 }
   0xb   :  { %s69_s21 = sshll.u32 %s847_s8, 4  ;;  %s52_s26 = sshll.u32 %s938_s3, 4  ;;  %s70_s21 = int_to_ptr.vmem [resolvable:$true] %s69_s21  ;;  %s53_s26 = int_to_ptr.hbm [resolvable:$true] %s52_s26 }
   0xc   :  { %75 = dma.hbm_to_vmem [thread:$0]  %s68_s18, 2048, %s70_s21, [#allocation10], %s845_s19, %s845_s19, %s846_s20  }
   0xd   :  { %s848_s27 = smov [#allocation3]   ;;  %s849_s5 = smov [#allocation8]  }
   0xe   :  { %s26_s28 = sshll.u32 %s848_s27, 4  ;;  %s54_s29 = sshll.u32 %s849_s5, 4  ;;  %s27_s28 = int_to_ptr.vmem [resolvable:$true] %s26_s28  ;;  %s55_s29 = int_to_ptr.vmem [resolvable:$true] %s54_s29 }
   0xf   :  { %32 = dma.hbm_to_vmem [thread:$0]  %s25_s24, 128, %s27_s28, [#allocation4], %s845_s19, %s845_s19, %s846_s20  }
  0x10   :  { %s850_s30 = smov 128   ;;  %s851_s10 = smov 8  }
  0x11   :  { %60 = dma.hbm_to_vmem [thread:$0]  %s53_s26, 2048, %s55_s29, [#allocation7], %s850_s30, %s850_s30, %s851_s10  }
  0x12   :  { %s81_s12 = sshll.u32 %s941_s6, 4  ;;  %s852_s13 = smov [#allocation11]   ;;  %s82_s12 = int_to_ptr.hbm [resolvable:$true] %s81_s12 }
  0x13   :  { %s83_s14 = sshll.u32 %s852_s13, 4  ;;  %s84_s14 = int_to_ptr.vmem [resolvable:$true] %s83_s14 }
  0x14   :  { %86 = dma.hbm_to_vmem [thread:$0]  %s82_s12, 16, %s84_s14, [#allocation10]  }
  0x15   :  { %836 = dma.done.wait [#allocation4], 128  }
  0x16   :  { %837 = vsyncadd [#allocation4], 4294967168 }
  0x17   :  { %838 = dma.done.wait [#allocation7], 2304  }
  0x18   :  { %839 = vsyncadd [#allocation7], 4294964992 }
  0x19   :  { %840 = dma.done.wait [#allocation10], 2064  }
  0x1a   :  { %841 = vsyncadd [#allocation10], 4294965232  ;;  %v645_v1 = vld [vmem:[#allocation6 + $0x8] sm:$0xff]  ;;  %v644_v2 = vld [vmem:[#allocation6] sm:$0xff]  ;;  %vm139_vm0 = vcmask 261120   ;;  %s854_s17 = smov [#allocation12]  }
  0x1b   :  { %v573_v3 = vld [vmem:[#allocation8 + $0x70] sm:$0xf]  ;;  %v661_v4 = vld [vmem:[#allocation8 + $0x74] sm:$0xf0]  ;;  %v660_v5 = vld [vmem:[#allocation8 + $0x74] sm:$0xf]  ;;  %149 = vmatpush.bf16.msra.mxu0 %v645_v1 }
  0x1c   :  { %v574_v6 = vor.u32 %v661_v4, %v573_v3  ;;  %v575_v7 = vld [vmem:[#allocation8 + $0x78] sm:$0xf0]  ;;  %v565_v8 = vld [vmem:[#allocation8 + $0x60] sm:$0xf]  ;;  %v659_v9 = vld [vmem:[#allocation8 + $0x64] sm:$0xf0] }
  0x1d   :  { %v578_v10 = vor.u32 %v660_v5, %v575_v7  ;;  %v658_v11 = vld [vmem:[#allocation8 + $0x64] sm:$0xf]  ;;  %v567_v12 = vld [vmem:[#allocation8 + $0x68] sm:$0xf0]  ;;  %v566_v13 = vor.u32 %v659_v9, %v565_v8  ;;  %v557_v16 = vld [vmem:[#allocation8 + $0x50] sm:$0xf] }
  0x1e   :  { %262 = vmatpush.bf16.msra.mxu1 %v574_v6  ;;  %v643_v14 = vld [vmem:[#allocation3] sm:$0xff]  ;;  %v570_v15 = vor.u32 %v658_v11, %v567_v12  ;;  %v657_v17 = vld [vmem:[#allocation8 + $0x54] sm:$0xf0]  ;;  %v656_v18 = vld [vmem:[#allocation8 + $0x54] sm:$0xf]  ;;  %s488_s18 = sshll.u32 %s854_s17, 4  ;;  %s489_s18 = int_to_ptr.vmem [resolvable:$true] %s488_s18 }
  0x1f   :  { %276 = vmatpush.bf16.msra.mxu2 %v578_v10  ;;  %150 = vmatpush.bf16.msra.mxu0 %v644_v2  ;;  %v559_v19 = vld [vmem:[#allocation8 + $0x58] sm:$0xf0]  ;;  %v558_v20 = vor.u32 %v657_v17, %v557_v16  ;;  %v549_v22 = vld [vmem:[#allocation8 + $0x40] sm:$0xf]  ;;  %v655_v23 = vld [vmem:[#allocation8 + $0x44] sm:$0xf0] }
  0x20   :  { %v562_v21 = vor.u32 %v656_v18, %v559_v19  ;;  %v654_v24 = vld [vmem:[#allocation8 + $0x44] sm:$0xf]  ;;  %v551_v25 = vld [vmem:[#allocation8 + $0x48] sm:$0xf0]  ;;  %v550_v26 = vor.u32 %v655_v23, %v549_v22  ;;  %v541_v28 = vld [vmem:[#allocation8 + $0x30] sm:$0xf] }
  0x21   :  { %v554_v27 = vor.u32 %v654_v24, %v551_v25  ;;  %v653_v29 = vld [vmem:[#allocation8 + $0x34] sm:$0xf0]  ;;  %v652_v30 = vld [vmem:[#allocation8 + $0x34] sm:$0xf]  ;;  %v543_v32 = vld [vmem:[#allocation8 + $0x38] sm:$0xf0] }
  0x22   :  { %263 = vmatpush.bf16.msra.mxu1 %v566_v13  ;;  %514 = vmatmul.msk.bf16.vlgmr.msra.gmra.mxu0 %vm139_vm0, %v643_v14  ;;  %v542_v31 = vor.u32 %v653_v29, %v541_v28  ;;  %v546_v33 = vor.u32 %v652_v30, %v543_v32  ;;  %v533_v34 = vld [vmem:[#allocation8 + $0x20] sm:$0xf]  ;;  %v651_v35 = vld [vmem:[#allocation8 + $0x24] sm:$0xf0]  ;;  %v650_v36 = vld [vmem:[#allocation8 + $0x24] sm:$0xf] }
  0x23   :  { %277 = vmatpush.bf16.msra.mxu2 %v570_v15  ;;  %v534_v37 = vor.u32 %v651_v35, %v533_v34  ;;  %v535_v38 = vld [vmem:[#allocation8 + $0x28] sm:$0xf0]  ;;  %v525_v40 = vld [vmem:[#allocation8 + $0x10] sm:$0xf]  ;;  %v649_v41 = vld [vmem:[#allocation8 + $0x14] sm:$0xf0] }
  0x24   :  { %v538_v39 = vor.u32 %v650_v36, %v535_v38  ;;  %v648_v42 = vld [vmem:[#allocation8 + $0x14] sm:$0xf]  ;;  %v526_v43 = vor.u32 %v649_v41, %v525_v40  ;;  %v527_v44 = vld [vmem:[#allocation8 + $0x18] sm:$0xf0]  ;;  %v517_v46 = vld [vmem:[#allocation8] sm:$0xf] }
  0x25   :  { %v530_v45 = vor.u32 %v648_v42, %v527_v44  ;;  %v647_v47 = vld [vmem:[#allocation8 + $0x4] sm:$0xf0]  ;;  %v646_v48 = vld [vmem:[#allocation8 + $0x4] sm:$0xf]  ;;  %v519_v50 = vld [vmem:[#allocation8 + $0x8] sm:$0xf0] }
  0x26   :  { %264 = vmatpush.bf16.msra.mxu1 %v558_v20  ;;  %v518_v49 = vor.u32 %v647_v47, %v517_v46  ;;  %v522_v51 = vor.u32 %v646_v48, %v519_v50  ;;  %v669_v52 = vld [vmem:[#allocation9 + $0x38] sm:$0xff]  ;;  %v668_v54 = vld [vmem:[#allocation9 + $0x30] sm:$0xff]  ;;  %v667_v56 = vld [vmem:[#allocation9 + $0x28] sm:$0xff]  ;;  %v853_v30 = vmov 0   ;;  %s490_s8 = sshll.u32 %s944_s9, 4  ;;  %vm481_vm1 = vcmask 122880   ;;  %s491_s8 = int_to_ptr.hbm [resolvable:$true] %s490_s8 }
  0x27   :  { %278 = vmatpush.bf16.msra.mxu2 %v562_v21  ;;  %v677_v53 = vld [vmem:[#allocation9 + $0x78] sm:$0xff]  ;;  %428 = vmatpush.bf16.msra.mxu3 %v669_v52  ;;  %v676_v55 = vld [vmem:[#allocation9 + $0x70] sm:$0xff]  ;;  %v675_v57 = vld [vmem:[#allocation9 + $0x68] sm:$0xff] }
  0x28   :  { %442 = vmatpush.bf16.msrb.mxu0 %v677_v53  ;;  %v666_v58 = vld [vmem:[#allocation9 + $0x20] sm:$0xff]  ;;  %v665_v3 = vld [vmem:[#allocation9 + $0x18] sm:$0xff]  ;;  %v664_v5 = vld [vmem:[#allocation9 + $0x10] sm:$0xff]  ;;  %689 = vset.pattern.permute.xlu0 %v853_v30 }
  0x29   :  { %v690_v60 = vld [vmem:[%s937_s2] ss:$0 sm:$0xff]  ;;  %v673_v6 = vld [vmem:[#allocation9 + $0x58] sm:$0xff]  ;;  %v663_v7 = vld [vmem:[#allocation9 + $0x8] sm:$0xff] }
  0x2a   :  { %265 = vmatpush.bf16.msra.mxu1 %v550_v26  ;;  %v674_v4 = vld [vmem:[#allocation9 + $0x60] sm:$0xff]  ;;  %v672_v8 = vld [vmem:[#allocation9 + $0x50] sm:$0xff]  ;;  %v671_v10 = vld [vmem:[#allocation9 + $0x48] sm:$0xff] }
  0x2b   :  { %279 = vmatpush.bf16.msra.mxu2 %v554_v27  ;;  %429 = vmatpush.bf16.msra.mxu3 %v668_v54  ;;  %v662_v9 = vld [vmem:[#allocation9] sm:$0xff] }
  0x2c   :  { %443 = vmatpush.bf16.msrb.mxu0 %v676_v55  ;;  %v670_v11 = vld [vmem:[#allocation9 + $0x40] sm:$0xff] }
  0x2d   :  { %v176_v12 = vld [vmem:[%s939_s4] sm:$0x3] }
  0x2e   :  { %266 = vmatpush.bf16.msra.mxu1 %v542_v31  ;;  %v178_v14 = vperm.slane %v176_v12, 0  ;;  %v179_v18 = vperm.slane %v176_v12, 1  ;;  %v473_v29 = vld [vmem:[#allocation2] sm:$0x1] }
  0x2f   :  { %280 = vmatpush.bf16.msra.mxu2 %v546_v33  ;;  %430 = vmatpush.bf16.msra.mxu3 %v667_v56  ;;  %v691_v33 = vld [vmem:[#allocation11] ss:$0 sm:$0xff] }
  0x30   :  { %444 = vmatpush.bf16.msrb.mxu0 %v675_v57  ;;  %476 = vperm.xlu0 %689, %v473_v29  }
  0x32   :  { %267 = vmatpush.bf16.msra.mxu1 %v534_v37 }
  0x33   :  { %281 = vmatpush.bf16.msra.mxu2 %v538_v39  ;;  %431 = vmatpush.bf16.msra.mxu3 %v666_v58 }
  0x34   :  { %445 = vmatpush.bf16.msrb.mxu0 %v674_v4 }
  0x36   :  { %268 = vmatpush.bf16.msra.mxu1 %v526_v43  ;;  %v459_v43 = vld [vmem:[%s942_s7] sm:$0xf] }
  0x37   :  { %282 = vmatpush.bf16.msra.mxu2 %v530_v45  ;;  %432 = vmatpush.bf16.msra.mxu3 %v665_v3 }
  0x38   :  { %446 = vmatpush.bf16.msrb.mxu0 %v673_v6 }
  0x3a   :  { %269 = vmatpush.bf16.msra.mxu1 %v518_v49 }
  0x3b   :  { %283 = vmatpush.bf16.msra.mxu2 %v522_v51  ;;  %433 = vmatpush.bf16.msra.mxu3 %v664_v5 }
  0x3c   :  { %447 = vmatpush.bf16.msrb.mxu0 %v672_v8 }
  0x3f   :  { %434 = vmatpush.bf16.msra.mxu3 %v663_v7 }
  0x40   :  { %448 = vmatpush.bf16.msrb.mxu0 %v671_v10 }
  0x43   :  { %435 = vmatpush.bf16.msra.mxu3 %v662_v9 }
  0x44   :  { %449 = vmatpush.bf16.msrb.mxu0 %v670_v11 }
  0x9f   :  { %v152_v59 = vpop.f32.mrf.mxu0 }
  0xa0   :  { %v153_v61 = vadd.f32 %v690_v60, %v152_v59 }
  0xa2   :  { %v157_v0 = vmax.f32 %v153_v61, 0.0  ;;  %v477_v44 = vpop.permute.xlu0 %476 }
  0xa3   :  { %v479_v45 = vperm.slane %v477_v44, 0 }
  0xa7   :  { %v154_v62 = vpop.f32.mrf.mxu0 }
  0xa8   :  { %v155_v63 = vadd.f32 %v690_v60, %v154_v62 }
  0xaa   :  { %v158_v1 = vmax.f32 %v155_v63, 0.0 }
  0xac   :  { %v159_v2 = vpack.c.bf16 %v158_v1, %v157_v0 }
  0xae   :  { %270 = vmatmul.bf16.vlgmr.msra.gmra.mxu1 %v159_v2  ;;  %284 = vmatmul.bf16.vlgmr.msra.gmra.mxu2 %v159_v2 }
 0x12b   :  { %v271_v13 = vpop.f32.mrf.mxu1 }
 0x12c   :  { %v272_v16 = vadd.f32 %v271_v13, %v178_v14 }
 0x12e   :  { %v290_v20 = vmax.f32 %v272_v16, 0.0 }
 0x131   :  { %v285_v15 = vpop.f32.mrf.mxu2 }
 0x132   :  { %v286_v22 = vadd.f32 %v285_v15, %v179_v18 }
 0x133   :  { %v273_v17 = vpop.f32.mrf.mxu1 }
 0x134   :  { %v274_v19 = vadd.f32 %v273_v17, %v178_v14  ;;  %v291_v26 = vmax.f32 %v286_v22, 0.0 }
 0x136   :  { %v292_v21 = vmax.f32 %v274_v19, 0.0 }
 0x138   :  { %v294_v23 = vpack.c.bf16 %v292_v21, %v290_v20 }
 0x139   :  { %v287_v24 = vpop.f32.mrf.mxu2 }
 0x13a   :  { %v288_v25 = vadd.f32 %v287_v24, %v179_v18  ;;  %436 = vmatmul.bf16.vlgmr.msra.gmra.mxu3 %v294_v23 }
 0x13c   :  { %v293_v27 = vmax.f32 %v288_v25, 0.0 }
 0x13e   :  { %v295_v28 = vpack.c.bf16 %v293_v27, %v291_v26 }
 0x140   :  { %450 = vmatmul.bf16.vlgmr.msrb.gmra.mxu0 %v295_v28 }
 0x1bd   :  { %v437_v31 = vpop.f32.mrf.mxu3  ;;  %v451_v32 = vpop.f32.mrf.mxu0 }
 0x1be   :  { %v438_v34 = vadd.f32 %v691_v33, %v437_v31 }
 0x1c0   :  { %v452_v36 = vadd.f32 %v451_v32, %v438_v34 }
 0x1c2   :  { %v456_v40 = vmax.f32 %v452_v36, 0.0 }
 0x1c5   :  { %v439_v35 = vpop.f32.mrf.mxu3  ;;  %v453_v38 = vpop.f32.mrf.mxu0 }
 0x1c6   :  { %v440_v37 = vadd.f32 %v691_v33, %v439_v35 }
 0x1c8   :  { %v454_v39 = vadd.f32 %v453_v38, %v440_v37 }
 0x1ca   :  { %v457_v41 = vmax.f32 %v454_v39, 0.0 }
 0x1cc   :  { %v458_v42 = vpack.c.bf16 %v457_v41, %v456_v40 }
 0x1ce   :  { %467 = vmatpush.bf16.xpose.msrb.mxu1 %v458_v42 }
 0x1d5   :  { %468 = vmatmul.bf16.vlgmr.msrb.gmra.mxu1 %v459_v43 }
 0x252   :  { %v469_v46 = vpop.f32.mrf.mxu1 }
 0x253   :  { %v480_v47 = vadd.f32 %v479_v45, %v469_v46 }
 0x255   :  { %482 = vst.msk [vmem:[#allocation12] sm:$0x1] %vm481_vm1, %v480_v47 }
 0x256   :  { %493 = dma.vmem_to_hbm [thread:$0]  %s489_s18, 16, %s491_s8, [#allocation5]  }
 0x25a   :  { %v471_v48 = vpop.f32.mrf.mxu1 }
 0x25b   :  { %842 = dma.done.wait [#allocation5], 16  }
 0x25c   :  { %843 = vsyncadd [#allocation5], 4294967280 }
 0x25d   :  { %498 = vsyncpa [#allocation4], 1 }
 0x25e   :  { %499 = vsyncpa [#allocation7], 1 }
 0x25f   :  { %500 = vsyncpa [#allocation10], 1 }
 0x260   :  { %501 = vsyncpa [#allocation5], 1 }

</bundles_post_ra>
